<compile_context>
chip_gen: v6e
topology: v6e:2x2x1
jax: 0.10.0
libtpu: 0.0.40
codegen_flags: <defaults>
</compile_context>

<pallas_src>
import functools

import jax
import jax.numpy as jnp
from jax.experimental import pallas as pl
from jax.experimental.pallas import tpu as pltpu


def _round_up(n, m):
    return ((n + m - 1) // m) * m


def _cdiv(a, b):
    return -(-a // b)


def _sigmoid(y):
    # Exact sigmoid in f32.  exp() is EUP work; the divide is cheap and the
    # epilogue has slack in this DMA-bound kernel.  Saturates cleanly.
    return 1.0 / (1.0 + jnp.exp(-y))


# ----------------------------------------------------------------------------
# Kernels
# ----------------------------------------------------------------------------
def _make_prologue_kernel(n_layers):
    """One-shot kernel for the tiny early layers.

    refs = (z, w0, b0, ..., w_{n-1}, b_{n-1}, out).  Weights bf16, biases f32.
    Output is the last hidden activation in bf16 (it is consumed as a bf16
    MXU operand by the last layer anyway, so nothing is lost numerically).
    """

    def kernel(*refs):
        z_ref = refs[0]
        o_ref = refs[1 + 2 * n_layers]
        h = z_ref[...].astype(jnp.float32)
        for i in range(n_layers):
            w_ref = refs[1 + 2 * i]
            b_ref = refs[2 + 2 * i]
            y = jnp.dot(h.astype(w_ref.dtype), w_ref[...],
                        preferred_element_type=jnp.float32)
            h = _sigmoid(y + b_ref[...])
        o_ref[...] = h.astype(o_ref.dtype)

    return kernel


def _last_layer_kernel(h_ref, w_ref, scale_ref, b_ref, o_ref):
    """One output tile of the big last layer: sigmoid((h @ W) * scale + b)."""
    h = h_ref[...]                       # (B_pad, H_pad) bf16
    w = w_ref[...]                       # (H_pad, tn) int8 or bf16
    if jnp.issubdtype(w_ref.dtype, jnp.integer):
        # Weight-only dequant: int8 values are exactly representable in bf16;
        # the per-column f32 scale is applied in the epilogue below.
        w = w.astype(jnp.float32).astype(jnp.bfloat16)
    y = jnp.dot(h, w, preferred_element_type=jnp.float32)
    y = y * scale_ref[...] + b_ref[...]            # f32 epilogue
    o_ref[...] = _sigmoid(y).astype(o_ref.dtype)   # bf16 writeback


# ----------------------------------------------------------------------------
# Parameter init / packing
# ----------------------------------------------------------------------------
def init_decoder_params(key, latent_dim, layers_sizes, out_dim,
                        dtype=jnp.float32):
    """Mirror nn.Linear init U(-1/sqrt(fan_in), 1/sqrt(fan_in)); W is (in, out)."""
    sizes = [latent_dim] + list(layers_sizes) + [out_dim]
    params = []
    for i in range(len(sizes) - 1):
        fan_in, fan_out = sizes[i], sizes[i + 1]
        key, kw, kb = jax.random.split(key, 3)
        bound = 1.0 / (fan_in ** 0.5)
        w = jax.random.uniform(kw, (fan_in, fan_out), dtype, -bound, bound)
        b = jax.random.uniform(kb, (fan_out,), dtype, -bound, bound)
        params.append((w, b))
    return params


def _quantize_per_column_int8(w):
    """Symmetric per-output-column int8 quantization of an (in, out) weight."""
    amax = jnp.max(jnp.abs(w), axis=0)
    scale = jnp.maximum(amax, 1e-8) / 127.0
    q = jnp.clip(jnp.round(w / scale), -127, 127).astype(jnp.int8)
    return q, scale.astype(jnp.float32)


def _choose_last_tiling(out_dim, tile_n):
    """Pick (tn, num_tiles): tn is a 128-multiple <= tile_n, tn*num_tiles >=
    out_dim (no remainder / no 128-lane fallback), and num_tiles is even when
    > 1 so the 'parallel' axis shards evenly over v7x's two TensorCores."""
    assert tile_n % 128 == 0 and tile_n > 0
    dout_128 = _round_up(out_dim, 128)
    if dout_128 <= tile_n:
        return dout_128, 1
    num_tiles = _cdiv(dout_128, tile_n)
    if num_tiles % 2:
        num_tiles += 1
    tn = _round_up(_cdiv(dout_128, num_tiles), 128)
    return tn, num_tiles


def prepare_decoder_params(params, *, tile_n=2048, quantize_last=True,
                           early_weight_dtype=jnp.bfloat16):
    """One-time packing of the torch-style params for the kernels.

    * Every feature dim is zero-padded to a multiple of 128 (lane-dense).
      Padded weight ROWS are zero, so the sigmoid(0)=0.5 values living in the
      padded hidden columns are annihilated by the next layer.
    * The last-layer output dim is additionally padded to tn * num_tiles so
      the pallas grid has no remainder tile (and an even length when > 1).
    * Early weights -> bf16.  Last weight -> int8 + per-column f32 scale
      (quantize_last=True) or bf16 with unit scales.
    """
    early = []
    for w, b in params[:-1]:
        din, dout = w.shape
        din_p, dout_p = _round_up(din, 128), _round_up(dout, 128)
        w_p = jnp.zeros((din_p, dout_p), early_weight_dtype)
        w_p = w_p.at[:din, :dout].set(w.astype(early_weight_dtype))
        b_p = jnp.zeros((1, dout_p), jnp.float32).at[:, :dout].set(
            b.astype(jnp.float32))
        early.append((w_p, b_p))

    w, b = params[-1]
    din, dout = w.shape
    din_p = _round_up(din, 128)
    tn, num_tiles = _choose_last_tiling(dout, tile_n)
    dout_p = tn * num_tiles
    if quantize_last:
        q, scale = _quantize_per_column_int8(w.astype(jnp.float32))
        w_p = jnp.zeros((din_p, dout_p), jnp.int8).at[:din, :dout].set(q)
        scale_p = jnp.ones((1, dout_p), jnp.float32).at[:, :dout].set(scale)
    else:
        w_p = jnp.zeros((din_p, dout_p), jnp.bfloat16).at[:din, :dout].set(
            w.astype(jnp.bfloat16))
        scale_p = jnp.ones((1, dout_p), jnp.float32)
    b_p = jnp.zeros((1, dout_p), jnp.float32).at[:, :dout].set(
        b.astype(jnp.float32))

    return {"early": early, "last_w": w_p, "last_scale": scale_p,
            "last_b": b_p, "tn": tn, "out_dim": dout}


# ----------------------------------------------------------------------------
# Forward
# ----------------------------------------------------------------------------
@functools.partial(jax.jit, static_argnames=("out_dim", "tn"))
def _decoder_forward(z, early_params, last_w, last_scale, last_b, *,
                     out_dim, tn):
    B, L = z.shape
    n_early = len(early_params)
    L_pad = early_params[0][0].shape[0] if n_early else last_w.shape[0]
    B_pad = _round_up(B, 16)          # bf16 LHS packs 2 rows per sublane
    z_p = jnp.zeros((B_pad, L_pad), jnp.float32).at[:B, :L].set(
        z.astype(jnp.float32))

    # ---- Prologue: all the tiny early layers, executed exactly once
    # (hoisted out of the per-output-tile loop -- no per-tile recompute).
    if n_early:
        h_pad = early_params[-1][0].shape[1]
        in_specs = [pl.BlockSpec((B_pad, L_pad), lambda i: (0, 0))]
        flat = [z_p]
        for w, b in early_params:
            in_specs.append(pl.BlockSpec(w.shape, lambda i: (0, 0)))
            in_specs.append(pl.BlockSpec(b.shape, lambda i: (0, 0)))
            flat += [w, b]
        h = pl.pallas_call(
            _make_prologue_kernel(n_early),
            out_shape=jax.ShapeDtypeStruct((B_pad, h_pad), jnp.bfloat16),
            grid=(1,),
            in_specs=in_specs,
            out_specs=pl.BlockSpec((B_pad, h_pad), lambda i: (0, 0)),
            compiler_params=pltpu.CompilerParams(
                dimension_semantics=("arbitrary",)),
        )(*flat)
    else:
        h_pad = L_pad
        h = z_p.astype(jnp.bfloat16)

    assert last_w.shape[0] == h_pad

    # ---- Last layer: wide output tiles, 'parallel' grid, streamed from HBM.
    dout_pad = last_w.shape[1]
    assert dout_pad % tn == 0
    grid = (dout_pad // tn,)

    w_bytes = last_w.size * last_w.dtype.itemsize
    cost = pl.CostEstimate(
        flops=2 * B_pad * h_pad * dout_pad,
        transcendentals=B_pad * dout_pad,   # one exp per output element
        bytes_accessed=(h.size * 2 + w_bytes + last_scale.size * 4
                        + last_b.size * 4 + B_pad * dout_pad * 2),
    )

    # VMEM per grid step at realistic shapes (hidden=512, tn=2048): int8 W
    # tile 1 MiB (x2 double-buffered) + bf16 out tile 64 KiB (x2) + bf16 h
    # 16 KiB  ->  ~2.2 MiB, far under the default 32 MiB scoped limit.  Raise
    # vmem_limit_bytes only if tn is pushed past ~8192.  If profiling shows
    # exposed DMA between steps, add pipeline_mode=pl.Buffered(3) to the
    # weight BlockSpec only (not speculatively).
    out_p = pl.pallas_call(
        _last_layer_kernel,
        out_shape=jax.ShapeDtypeStruct((B_pad, dout_pad), jnp.bfloat16),
        grid=grid,
        in_specs=[
            pl.BlockSpec((B_pad, h_pad), lambda j: (0, 0)),   # activation
            pl.BlockSpec((h_pad, tn), lambda j: (0, j)),      # weight tile
            pl.BlockSpec((1, tn), lambda j: (0, j)),          # per-col scale
            pl.BlockSpec((1, tn), lambda j: (0, j)),          # bias
        ],
        out_specs=pl.BlockSpec((B_pad, tn), lambda j: (0, j)),
        compiler_params=pltpu.CompilerParams(
            dimension_semantics=("parallel",)),
        cost_estimate=cost,
    )(h, last_w, last_scale, last_b)

    return out_p[:B, :out_dim].astype(jnp.float32)


def decoder_linear_forward(z, prep):
    """Run the full decoder on prepared params."""
    return _decoder_forward(z, prep["early"], prep["last_w"],
                            prep["last_scale"], prep["last_b"],
                            out_dim=prep["out_dim"], tn=prep["tn"])


# ----------------------------------------------------------------------------
# References (for testing)
# ----------------------------------------------------------------------------
def _reference_kernel_numerics(z, prep):
    """Pure-JAX mirror of the kernel numerics (bf16 MXU operands, f32 accum,
    int8 weight dequant, bf16 intermediate/output rounding)."""
    B, L = z.shape
    early = prep["early"]
    last_w, last_scale, last_b = prep["last_w"], prep["last_scale"], prep["last_b"]
    L_pad = early[0][0].shape[0] if early else last_w.shape[0]
    B_pad = _round_up(B, 16)
    h = jnp.zeros((B_pad, L_pad), jnp.float32).at[:B, :L].set(
        z.astype(jnp.float32))
    for w, b in early:
        y = jnp.dot(h.astype(jnp.bfloat16), w,
                    preferred_element_type=jnp.float32) + b
        h = 1.0 / (1.0 + jnp.exp(-y))
    h = h.astype(jnp.bfloat16)
    w = last_w
    if jnp.issubdtype(w.dtype, jnp.integer):
        w = w.astype(jnp.float32).astype(jnp.bfloat16)
    y = jnp.dot(h, w, preferred_element_type=jnp.float32) * last_scale + last_b
    out = (1.0 / (1.0 + jnp.exp(-y))).astype(jnp.bfloat16).astype(jnp.float32)
    return out[:B, :prep["out_dim"]]


def _reference_f32(z, params):
    """Torch-semantics f32 reference (documents the bf16/int8 deviation)."""
    h = z.astype(jnp.float32)
    for w, b in params:
        h = jax.nn.sigmoid(jnp.dot(h, w) + b)
    return h


# ----------------------------------------------------------------------------
if __name__ == "__main__":
    key = jax.random.PRNGKey(0)
    k_z, k_p = jax.random.split(key)

    batch, latent_dim = 8, 10
    layers_sizes = [32, 64]     # small stand-ins for the default [250, 500]
    z = jax.random.normal(k_z, (batch, latent_dim), jnp.float32)

    def run_case(out_dim, tile_n, quantize_last):
        params = init_decoder_params(k_p, latent_dim, layers_sizes, out_dim)
        prep = prepare_decoder_params(params, tile_n=tile_n,
                                      quantize_last=quantize_last)
        out = decoder_linear_forward(z, prep)
        jax.block_until_ready(out)
        assert out.shape == (batch, out_dim)

        ref = _reference_kernel_numerics(z, prep)       # same numerics
        err = float(jnp.max(jnp.abs(out - ref)))
        assert jnp.allclose(out, ref, atol=5e-3, rtol=5e-3), err

        ref32 = _reference_f32(z, params)               # torch f32 semantics
        err32 = float(jnp.max(jnp.abs(out - ref32)))
        assert jnp.allclose(out, ref32, atol=3e-2, rtol=3e-2), err32
        return out

    # Single-tile path, int8 last-layer weight, default wide tiles.
    run_case(out_dim=16, tile_n=2048, quantize_last=True)
    # Multi-tile path (even grid of 2 tiles), int8 last-layer weight.
    run_case(out_dim=300, tile_n=256, quantize_last=True)
    # bf16 last-layer weight path.
    run_case(out_dim=300, tile_n=256, quantize_last=False)

    print("KERNEL_OK")
</pallas_src>

<mosaic_0001>
module attributes {stable_mosaic.version = 11 : i64} {
  func.func @kernel(%arg0: i32, %arg1: memref<16x128xf32, #tpu.memory_space<vmem>>, %arg2: memref<128x128xbf16, #tpu.memory_space<vmem>>, %arg3: memref<1x128xf32, #tpu.memory_space<vmem>>, %arg4: memref<128x128xbf16, #tpu.memory_space<vmem>>, %arg5: memref<1x128xf32, #tpu.memory_space<vmem>>, %arg6: memref<16x128xbf16, #tpu.memory_space<vmem>>) attributes {dimension_semantics = [#tpu.dimension_semantics<arbitrary>], iteration_bounds = array<i64: 1>, scalar_prefetch = 0 : i64, scratch_operands = 0 : i64, tpu.core_type = #tpu.core_type<tc>, window_params = [{pipeline_mode = #tpu.pipeline_mode<synchronous>, transform_indices = @transform_0, window_bounds = array<i64: 16, 128>}, {pipeline_mode = #tpu.pipeline_mode<synchronous>, transform_indices = @transform_1, window_bounds = array<i64: 128, 128>}, {pipeline_mode = #tpu.pipeline_mode<synchronous>, transform_indices = @transform_2, window_bounds = array<i64: 1, 128>}, {pipeline_mode = #tpu.pipeline_mode<synchronous>, transform_indices = @transform_3, window_bounds = array<i64: 128, 128>}, {pipeline_mode = #tpu.pipeline_mode<synchronous>, transform_indices = @transform_4, window_bounds = array<i64: 1, 128>}, {pipeline_mode = #tpu.pipeline_mode<synchronous>, transform_indices = @transform_5, window_bounds = array<i64: 16, 128>}]} {
    %c0 = arith.constant 0 : index
    %c0_0 = arith.constant 0 : index
    %0 = vector.load %arg1[%c0, %c0_0] : memref<16x128xf32, #tpu.memory_space<vmem>>, vector<16x128xf32>
    %1 = arith.truncf %0 : vector<16x128xf32> to vector<16x128xbf16>
    %c0_1 = arith.constant 0 : index
    %c0_2 = arith.constant 0 : index
    %2 = vector.load %arg2[%c0_1, %c0_2] : memref<128x128xbf16, #tpu.memory_space<vmem>>, vector<128x128xbf16>
    %cst = arith.constant dense<0.000000e+00> : vector<16x128xf32>
    %3 = tpu.matmul %1, %2, %cst {dimension_numbers = #tpu.dot_dimension_numbers<[1], [0], [0], [1], [0, 0, 1, 1], [], []>} : vector<16x128xbf16>, vector<128x128xbf16>, vector<16x128xf32> -> vector<16x128xf32>
    %c0_3 = arith.constant 0 : index
    %c0_4 = arith.constant 0 : index
    %4 = vector.load %arg3[%c0_3, %c0_4] : memref<1x128xf32, #tpu.memory_space<vmem>>, vector<1x128xf32>
    %5 = vector.broadcast %4 : vector<1x128xf32> to vector<16x128xf32>
    %6 = arith.addf %3, %5 : vector<16x128xf32>
    %cst_5 = arith.constant 0.000000e+00 : f32
    %7 = vector.broadcast %cst_5 : f32 to vector<16x128xf32>
    %8 = arith.subf %7, %6 : vector<16x128xf32>
    %9 = math.exp %8 : vector<16x128xf32>
    %cst_6 = arith.constant 1.000000e+00 : f32
    %10 = vector.broadcast %cst_6 : f32 to vector<16x128xf32>
    %11 = arith.addf %10, %9 : vector<16x128xf32>
    %cst_7 = arith.constant 1.000000e+00 : f32
    %12 = vector.broadcast %cst_7 : f32 to vector<16x128xf32>
    %13 = arith.divf %12, %11 : vector<16x128xf32>
    %14 = arith.truncf %13 : vector<16x128xf32> to vector<16x128xbf16>
    %c0_8 = arith.constant 0 : index
    %c0_9 = arith.constant 0 : index
    %15 = vector.load %arg4[%c0_8, %c0_9] : memref<128x128xbf16, #tpu.memory_space<vmem>>, vector<128x128xbf16>
    %cst_10 = arith.constant dense<0.000000e+00> : vector<16x128xf32>
    %16 = tpu.matmul %14, %15, %cst_10 {dimension_numbers = #tpu.dot_dimension_numbers<[1], [0], [0], [1], [0, 0, 1, 1], [], []>} : vector<16x128xbf16>, vector<128x128xbf16>, vector<16x128xf32> -> vector<16x128xf32>
    %c0_11 = arith.constant 0 : index
    %c0_12 = arith.constant 0 : index
    %17 = vector.load %arg5[%c0_11, %c0_12] : memref<1x128xf32, #tpu.memory_space<vmem>>, vector<1x128xf32>
    %18 = vector.broadcast %17 : vector<1x128xf32> to vector<16x128xf32>
    %19 = arith.addf %16, %18 : vector<16x128xf32>
    %cst_13 = arith.constant 0.000000e+00 : f32
    %20 = vector.broadcast %cst_13 : f32 to vector<16x128xf32>
    %21 = arith.subf %20, %19 : vector<16x128xf32>
    %22 = math.exp %21 : vector<16x128xf32>
    %cst_14 = arith.constant 1.000000e+00 : f32
    %23 = vector.broadcast %cst_14 : f32 to vector<16x128xf32>
    %24 = arith.addf %23, %22 : vector<16x128xf32>
    %cst_15 = arith.constant 1.000000e+00 : f32
    %25 = vector.broadcast %cst_15 : f32 to vector<16x128xf32>
    %26 = arith.divf %25, %24 : vector<16x128xf32>
    %27 = arith.truncf %26 : vector<16x128xf32> to vector<16x128xbf16>
    %c0_16 = arith.constant 0 : index
    %c0_17 = arith.constant 0 : index
    %28 = vector.load %arg6[%c0_16, %c0_17] : memref<16x128xbf16, #tpu.memory_space<vmem>>, vector<16x128xbf16>
    tpu.vector_store %arg6[%c0_16, %c0_17], %27 {strides = array<i32>} : memref<16x128xbf16, #tpu.memory_space<vmem>>, vector<16x128xbf16>,
    return
  }
  func.func @transform_0(%arg0: i32) -> (i32, i32) {
    %c0_i32 = arith.constant 0 : i32
    %c0_i32_0 = arith.constant 0 : i32
    %c0_i32_1 = arith.constant 0 : i32
    return %c0_i32, %c0_i32_0 : i32, i32
  }
  func.func @transform_1(%arg0: i32) -> (i32, i32) {
    %c0_i32 = arith.constant 0 : i32
    %c0_i32_0 = arith.constant 0 : i32
    %c0_i32_1 = arith.constant 0 : i32
    return %c0_i32, %c0_i32_0 : i32, i32
  }
  func.func @transform_2(%arg0: i32) -> (i32, i32) {
    %c0_i32 = arith.constant 0 : i32
    %c0_i32_0 = arith.constant 0 : i32
    %c0_i32_1 = arith.constant 0 : i32
    return %c0_i32, %c0_i32_0 : i32, i32
  }
  func.func @transform_3(%arg0: i32) -> (i32, i32) {
    %c0_i32 = arith.constant 0 : i32
    %c0_i32_0 = arith.constant 0 : i32
    %c0_i32_1 = arith.constant 0 : i32
    return %c0_i32, %c0_i32_0 : i32, i32
  }
  func.func @transform_4(%arg0: i32) -> (i32, i32) {
    %c0_i32 = arith.constant 0 : i32
    %c0_i32_0 = arith.constant 0 : i32
    %c0_i32_1 = arith.constant 0 : i32
    return %c0_i32, %c0_i32_0 : i32, i32
  }
  func.func @transform_5(%arg0: i32) -> (i32, i32) {
    %c0_i32 = arith.constant 0 : i32
    %c0_i32_0 = arith.constant 0 : i32
    %c0_i32_1 = arith.constant 0 : i32
    return %c0_i32, %c0_i32_0 : i32, i32
  }
}

module attributes {stable_mosaic.version = 11 : i64} {
  func.func @_last_layer_kernel(%arg0: i32, %arg1: memref<16x128xbf16, #tpu.memory_space<vmem>>, %arg2: memref<128x128xi8, #tpu.memory_space<vmem>>, %arg3: memref<1x128xf32, #tpu.memory_space<vmem>>, %arg4: memref<1x128xf32, #tpu.memory_space<vmem>>, %arg5: memref<16x128xbf16, #tpu.memory_space<vmem>>) attributes {dimension_semantics = [#tpu.dimension_semantics<parallel>], iteration_bounds = array<i64: 1>, scalar_prefetch = 0 : i64, scratch_operands = 0 : i64, tpu.core_type = #tpu.core_type<tc>, window_params = [{pipeline_mode = #tpu.pipeline_mode<synchronous>, transform_indices = @transform_0, window_bounds = array<i64: 16, 128>}, {transform_indices = @transform_1, window_bounds = array<i64: 128, 128>}, {transform_indices = @transform_2, window_bounds = array<i64: 1, 128>}, {transform_indices = @transform_3, window_bounds = array<i64: 1, 128>}, {transform_indices = @transform_4, window_bounds = array<i64: 16, 128>}]} {
    %c0 = arith.constant 0 : index
    %c0_0 = arith.constant 0 : index
    %0 = vector.load %arg1[%c0, %c0_0] : memref<16x128xbf16, #tpu.memory_space<vmem>>, vector<16x128xbf16>
    %c0_1 = arith.constant 0 : index
    %c0_2 = arith.constant 0 : index
    %1 = vector.load %arg2[%c0_1, %c0_2] : memref<128x128xi8, #tpu.memory_space<vmem>>, vector<128x128xi8>
    %2 = arith.sitofp %1 : vector<128x128xi8> to vector<128x128xf32>
    %3 = arith.truncf %2 : vector<128x128xf32> to vector<128x128xbf16>
    %cst = arith.constant dense<0.000000e+00> : vector<16x128xf32>
    %4 = tpu.matmul %0, %3, %cst {dimension_numbers = #tpu.dot_dimension_numbers<[1], [0], [0], [1], [0, 0, 1, 1], [], []>} : vector<16x128xbf16>, vector<128x128xbf16>, vector<16x128xf32> -> vector<16x128xf32>
    %c0_3 = arith.constant 0 : index
    %c0_4 = arith.constant 0 : index
    %5 = vector.load %arg3[%c0_3, %c0_4] : memref<1x128xf32, #tpu.memory_space<vmem>>, vector<1x128xf32>
    %6 = vector.broadcast %5 : vector<1x128xf32> to vector<16x128xf32>
    %7 = arith.mulf %4, %6 : vector<16x128xf32>
    %c0_5 = arith.constant 0 : index
    %c0_6 = arith.constant 0 : index
    %8 = vector.load %arg4[%c0_5, %c0_6] : memref<1x128xf32, #tpu.memory_space<vmem>>, vector<1x128xf32>
    %9 = vector.broadcast %8 : vector<1x128xf32> to vector<16x128xf32>
    %10 = arith.addf %7, %9 : vector<16x128xf32>
    %cst_7 = arith.constant 0.000000e+00 : f32
    %11 = vector.broadcast %cst_7 : f32 to vector<16x128xf32>
    %12 = arith.subf %11, %10 : vector<16x128xf32>
    %13 = math.exp %12 : vector<16x128xf32>
    %cst_8 = arith.constant 1.000000e+00 : f32
    %14 = vector.broadcast %cst_8 : f32 to vector<16x128xf32>
    %15 = arith.addf %14, %13 : vector<16x128xf32>
    %cst_9 = arith.constant 1.000000e+00 : f32
    %16 = vector.broadcast %cst_9 : f32 to vector<16x128xf32>
    %17 = arith.divf %16, %15 : vector<16x128xf32>
    %18 = arith.truncf %17 : vector<16x128xf32> to vector<16x128xbf16>
    %c0_10 = arith.constant 0 : index
    %c0_11 = arith.constant 0 : index
    %19 = vector.load %arg5[%c0_10, %c0_11] : memref<16x128xbf16, #tpu.memory_space<vmem>>, vector<16x128xbf16>
    tpu.vector_store %arg5[%c0_10, %c0_11], %18 {strides = array<i32>} : memref<16x128xbf16, #tpu.memory_space<vmem>>, vector<16x128xbf16>,
    return
  }
  func.func @transform_0(%arg0: i32) -> (i32, i32) {
    %c0_i32 = arith.constant 0 : i32
    %c0_i32_0 = arith.constant 0 : i32
    %c0_i32_1 = arith.constant 0 : i32
    return %c0_i32, %c0_i32_0 : i32, i32
  }
  func.func @transform_1(%arg0: i32) -> (i32, i32) {
    %c0_i32 = arith.constant 0 : i32
    %c0_i32_0 = arith.constant 0 : i32
    return %c0_i32, %arg0 : i32, i32
  }
  func.func @transform_2(%arg0: i32) -> (i32, i32) {
    %c0_i32 = arith.constant 0 : i32
    %c0_i32_0 = arith.constant 0 : i32
    return %c0_i32, %arg0 : i32, i32
  }
  func.func @transform_3(%arg0: i32) -> (i32, i32) {
    %c0_i32 = arith.constant 0 : i32
    %c0_i32_0 = arith.constant 0 : i32
    return %c0_i32, %arg0 : i32, i32
  }
  func.func @transform_4(%arg0: i32) -> (i32, i32) {
    %c0_i32 = arith.constant 0 : i32
    %c0_i32_0 = arith.constant 0 : i32
    return %c0_i32, %arg0 : i32, i32
  }
}

</mosaic_0001>

<bundles_post_ra>
// kernel: _decoder_forward.3
= control target key start
LH: loop header
LB: loop body
LE: loop exit
PB: predicated region body
PF: predicated region fallthrough
CT: control target
= control target key end

     0   :  { %v175_v0 = vmov 0.0   ;;  %vm176_vm0 = vmmov 0   ;;  %s226_s1 = inlined_call_operand.vmem [shape: s8[128,128], index: 1, kind: input, shape index: {}]   ;;  %s227_s0 = inlined_call_operand.vmem [shape: bf16[16,128], index: 0, kind: input, shape index: {}]   ;;  %s228_s2 = inlined_call_operand.vmem [shape: f32[1,128], index: 2, kind: input, shape index: {}]   ;;  %s229_s3 = inlined_call_operand.vmem [shape: f32[1,128], index: 3, kind: input, shape index: {}]   ;;  %s230_s4 = inlined_call_operand.vmem [shape: bf16[16,128], index: 4, kind: output, shape index: {}]  }
   0x1   :  { %144 = vmatprep.subr.bf16.mxu0 %v175_v0  ;;  %v23_v1 = vld [vmem:[%s226_s1 + $0x18] sm:$0xff]  ;;  %160 = vmatprep.mubr.msk.bf16.mxu0 %vm176_vm0, %v175_v0  ;;  %v22_v4 = vld [vmem:[%s226_s1 + $0x10] sm:$0xff]  ;;  %v21_v7 = vld [vmem:[%s226_s1 + $0x8] sm:$0xff] }
   0x2   :  { %v31_v2 = vunpack.c.h.s8.bf16 %v23_v1  ;;  %v30_v3 = vunpack.c.l.s8.bf16 %v23_v1  ;;  %v29_v5 = vunpack.c.h.s8.bf16 %v22_v4  ;;  %v28_v6 = vunpack.c.l.s8.bf16 %v22_v4  ;;  %v20_v10 = vld [vmem:[%s226_s1] sm:$0xff] }
   0x3   :  { %v27_v8 = vunpack.c.h.s8.bf16 %v21_v7  ;;  %v26_v9 = vunpack.c.l.s8.bf16 %v21_v7  ;;  %v25_v11 = vunpack.c.h.s8.bf16 %v20_v10  ;;  %v24_v12 = vunpack.c.l.s8.bf16 %v20_v10  ;;  %v166_v13 = vld [vmem:[%s227_s0] sm:$0xff]  }
   0x4   :  { %145 = vmatpush3.bf16.msra.mxu0 %v31_v2  ;;  %v124_v14 = vld [vmem:[%s228_s2] ss:$0 sm:$0xff] }
   0x5   :  { %146 = vmatprep.subr.bf16.mxu0 %v175_v0  ;;  %v125_v16 = vld [vmem:[%s229_s3] ss:$0 sm:$0xff] }
   0x8   :  { %147 = vmatpush3.bf16.msra.mxu0 %v30_v3 }
   0x9   :  { %148 = vmatprep.subr.bf16.mxu0 %v175_v0 }
   0xc   :  { %149 = vmatpush3.bf16.msra.mxu0 %v29_v5 }
   0xd   :  { %150 = vmatprep.subr.bf16.mxu0 %v175_v0 }
  0x10   :  { %151 = vmatpush3.bf16.msra.mxu0 %v28_v6 }
  0x11   :  { %152 = vmatprep.subr.bf16.mxu0 %v175_v0 }
  0x14   :  { %153 = vmatpush3.bf16.msra.mxu0 %v27_v8 }
  0x15   :  { %154 = vmatprep.subr.bf16.mxu0 %v175_v0 }
  0x18   :  { %155 = vmatpush3.bf16.msra.mxu0 %v26_v9 }
  0x19   :  { %156 = vmatprep.subr.bf16.mxu0 %v175_v0 }
  0x1c   :  { %157 = vmatpush3.bf16.msra.mxu0 %v25_v11 }
  0x1d   :  { %158 = vmatprep.subr.bf16.mxu0 %v175_v0 }
  0x20   :  { %159 = vmatpush3.bf16.msra.mxu0 %v24_v12 }
  0x23   :  { %161 = vmatmul.mubr.bf16.vlgmr.msra.gmra.mxu0 %v166_v13 }
  0xe3   :  { %v72_v15 = vpop.f32.mrf.mxu0 }
  0xe4   :  { %v86_v17 = vmul.f32 %v124_v14, %v72_v15 }
  0xe5   :  { %v162_v18 = vpop.f32.mrf.mxu0 }
  0xe6   :  { %v95_v19 = vadd.f32 %v125_v16, %v86_v17 }
  0xe7   :  { %v75_v20 = vpop.f32.mrf.mxu0 }
  0xe8   :  { %v97_v21 = vsub.f32 0.0, %v95_v19  ;;  %v87_v22 = vmul.f32 %v124_v14, %v75_v20 }
  0xe9   :  { %v163_v23 = vpop.f32.mrf.mxu0 }
  0xea   :  { %v99_v24 = vmul.f32 1.442695, %v97_v21  ;;  %v96_v25 = vadd.f32 %v125_v16, %v87_v22 }
  0xec   :  { %167 = vpow2.f32 %v99_v24  ;;  %v98_v26 = vsub.f32 0.0, %v96_v25 }
  0xee   :  { %v101_v27 = vmul.f32 1.442695, %v98_v26 }
  0xf0   :  { %169 = vpow2.f32 %v101_v27 }
  0xf9   :  { %v168_v28 = vpop.eup %167 }
  0xfa   :  { %v103_v29 = vadd.f32 1.0, %v168_v28 }
  0xfc   :  { %171 = vrcp.f32 %v103_v29 }
  0xfd   :  { %v170_v30 = vpop.eup %169 }
  0xfe   :  { %v104_v31 = vadd.f32 1.0, %v170_v30 }
 0x100   :  { %173 = vrcp.f32 %v104_v31 }
 0x109   :  { %v172_v32 = vpop.eup %171 }
 0x10d   :  { %v174_v33 = vpop.eup %173 }
 0x10e   :  { %v133_v34 = vpack.c.bf16 %v174_v33, %v172_v32 }
 0x110   :  { %134 = vst [vmem:[%s230_s4] sm:$0xff] %v133_v34  }

// kernel: _decoder_forward.2
= control target key start
LH: loop header
LB: loop body
LE: loop exit
PB: predicated region body
PF: predicated region fallthrough
CT: control target
= control target key end

     0   :  { %10 = vsyncpa [#allocation3], 0  ;;  %s541_s0 = inlined_call_operand.vmem [shape: f32[16,128], index: 0, kind: input, shape index: {}]   ;;  %s542_s1 = inlined_call_operand.hbm [shape: bf16[128,128], index: 1, kind: input, shape index: {}]   ;;  %s543_s2 = inlined_call_operand.vmem [shape: f32[1,128], index: 2, kind: input, shape index: {}]   ;;  %s544_s3 = inlined_call_operand.hbm [shape: bf16[128,128], index: 3, kind: input, shape index: {}]   ;;  %s545_s4 = inlined_call_operand.vmem [shape: f32[1,128], index: 4, kind: input, shape index: {}]   ;;  %s546_s5 = inlined_call_operand.vmem [shape: bf16[16,128], index: 5, kind: output, shape index: {}]  }
   0x1   :  { %11 = vsyncpa [#allocation5], 0  ;;  %s484_s18 = smov [#allocation2]  }
   0x2   :  { %s19_s19 = sshll.u32 %s484_s18, 4  ;;  %s20_s19 = int_to_ptr.vmem [resolvable:$true] %s19_s19 }
   0x3   :  { %s448_s20 = scalar_lea.vmem %s20_s19, 1024  ;;  %p453_p1 = scmp.lt.s32.totalorder %s20_s19, %s20_s19 }
   0x4   :  { %p449_p0 = scmp.ne.s32.totalorder %s20_s19, %s448_s20  ;;  %p454_p2 = scmp.lt.s32.totalorder %s448_s20, %s448_s20 }
   0x6   :  { %p455_p3 = por %p454_p2, %p453_p1 }
   0x8   :  { %p456_p4 = pnand %p455_p3, %p449_p0 }
   0xa   :  { %459 = shalt.err (!%p456_p4)
}
   0xb   :  { %s485_s21 = smov 64   ;;  %s486_s22 = smov 4  }
   0xc   :  { %25 = dma.hbm_to_vmem [thread:$0]  %s542_s1, 1024, %s20_s19, [#allocation3], %s485_s21, %s485_s21, %s486_s22  }
   0xd   :  { %s487_s25 = smov [#allocation4]  }
   0xe   :  { %s33_s26 = sshll.u32 %s487_s25, 4  ;;  %s34_s26 = int_to_ptr.vmem [resolvable:$true] %s33_s26 }
   0xf   :  { %s468_s27 = scalar_lea.vmem %s34_s26, 1024  ;;  %p473_p6 = scmp.lt.s32.totalorder %s34_s26, %s34_s26 }
  0x10   :  { %p469_p5 = scmp.ne.s32.totalorder %s34_s26, %s468_s27  ;;  %p474_p7 = scmp.lt.s32.totalorder %s468_s27, %s468_s27 }
  0x12   :  { %p475_p8 = por %p474_p7, %p473_p6 }
  0x14   :  { %p476_p9 = pnand %p475_p8, %p469_p5 }
  0x16   :  { %479 = shalt.err (!%p476_p9)
}
  0x17   :  { %39 = dma.hbm_to_vmem [thread:$0]  %s544_s3, 1024, %s34_s26, [#allocation5], %s485_s21, %s485_s21, %s486_s22  }
  0x18   :  { %480 = dma.done.wait [#allocation3], 1024  }
  0x19   :  { %481 = vsyncadd [#allocation3], 4294966272 }
  0x1a   :  { %482 = dma.done.wait [#allocation5], 1024  }
  0x1b   :  { %483 = vsyncadd [#allocation5], 4294966272  ;;  %v488_v0 = vmov 0.0   ;;  %vm489_vm0 = vmmov 0   ;;  %v408_v1 = vld [vmem:[#allocation2 + $0x38] sm:$0xff]   ;;  %v409_v2 = vld [vmem:[#allocation2 + $0x30] sm:$0xff]  }
  0x1c   :  { %362 = vmatprep.subr.bf16.mxu0 %v488_v0  ;;  %378 = vmatprep.mubr.msk.bf16.mxu0 %vm489_vm0, %v488_v0  ;;  %v410_v3 = vld [vmem:[#allocation2 + $0x28] sm:$0xff]   ;;  %v411_v4 = vld [vmem:[#allocation2 + $0x20] sm:$0xff]   ;;  %v412_v5 = vld [vmem:[#allocation2 + $0x18] sm:$0xff]  }
  0x1d   :  { %382 = vmatprep.subr.bf16.mxu1 %v488_v0  ;;  %398 = vmatprep.mubr.msk.bf16.mxu1 %vm489_vm0, %v488_v0  ;;  %v413_v6 = vld [vmem:[#allocation2 + $0x10] sm:$0xff]   ;;  %v414_v7 = vld [vmem:[#allocation2 + $0x8] sm:$0xff]   ;;  %v415_v8 = vld [vmem:[#allocation2] sm:$0xff]  }
  0x1e   :  { %363 = vmatpush3.bf16.msra.mxu0 %v408_v1  ;;  %v49_v9 = vld [vmem:[%s541_s0] sm:$0xff]  ;;  %v50_v10 = vld [vmem:[%s541_s0 + $0x8] sm:$0xff]  ;;  %v416_v12 = vld [vmem:[#allocation4 + $0x38] sm:$0xff]  }
  0x1f   :  { %364 = vmatprep.subr.bf16.mxu0 %v488_v0  ;;  %v51_v11 = vpack.c.bf16 %v50_v10, %v49_v9  ;;  %383 = vmatpush3.bf16.msra.mxu1 %v416_v12  ;;  %v417_v13 = vld [vmem:[#allocation4 + $0x30] sm:$0xff]   ;;  %v418_v14 = vld [vmem:[#allocation4 + $0x28] sm:$0xff]   ;;  %v419_v15 = vld [vmem:[#allocation4 + $0x20] sm:$0xff]  }
  0x20   :  { %384 = vmatprep.subr.bf16.mxu1 %v488_v0  ;;  %v420_v16 = vld [vmem:[#allocation4 + $0x18] sm:$0xff]   ;;  %v421_v17 = vld [vmem:[#allocation4 + $0x10] sm:$0xff]   ;;  %v422_v18 = vld [vmem:[#allocation4 + $0x8] sm:$0xff]  }
  0x21   :  { %v423_v19 = vld [vmem:[#allocation4] sm:$0xff]  }
  0x22   :  { %365 = vmatpush3.bf16.msra.mxu0 %v409_v2  ;;  %v317_v20 = vld [vmem:[%s543_s2] ss:$0 sm:$0xff] }
  0x23   :  { %366 = vmatprep.subr.bf16.mxu0 %v488_v0  ;;  %385 = vmatpush3.bf16.msra.mxu1 %v417_v13  ;;  %v326_v38 = vld [vmem:[%s545_s4] ss:$0 sm:$0xff] }
  0x24   :  { %386 = vmatprep.subr.bf16.mxu1 %v488_v0 }
  0x26   :  { %367 = vmatpush3.bf16.msra.mxu0 %v410_v3 }
  0x27   :  { %368 = vmatprep.subr.bf16.mxu0 %v488_v0  ;;  %387 = vmatpush3.bf16.msra.mxu1 %v418_v14 }
  0x28   :  { %388 = vmatprep.subr.bf16.mxu1 %v488_v0 }
  0x2a   :  { %369 = vmatpush3.bf16.msra.mxu0 %v411_v4 }
  0x2b   :  { %370 = vmatprep.subr.bf16.mxu0 %v488_v0  ;;  %389 = vmatpush3.bf16.msra.mxu1 %v419_v15 }
  0x2c   :  { %390 = vmatprep.subr.bf16.mxu1 %v488_v0 }
  0x2e   :  { %371 = vmatpush3.bf16.msra.mxu0 %v412_v5 }
  0x2f   :  { %372 = vmatprep.subr.bf16.mxu0 %v488_v0  ;;  %391 = vmatpush3.bf16.msra.mxu1 %v420_v16 }
  0x30   :  { %392 = vmatprep.subr.bf16.mxu1 %v488_v0 }
  0x32   :  { %373 = vmatpush3.bf16.msra.mxu0 %v413_v6 }
  0x33   :  { %374 = vmatprep.subr.bf16.mxu0 %v488_v0  ;;  %393 = vmatpush3.bf16.msra.mxu1 %v421_v17 }
  0x34   :  { %394 = vmatprep.subr.bf16.mxu1 %v488_v0 }
  0x36   :  { %375 = vmatpush3.bf16.msra.mxu0 %v414_v7 }
  0x37   :  { %376 = vmatprep.subr.bf16.mxu0 %v488_v0  ;;  %395 = vmatpush3.bf16.msra.mxu1 %v422_v18 }
  0x38   :  { %396 = vmatprep.subr.bf16.mxu1 %v488_v0 }
  0x3a   :  { %377 = vmatpush3.bf16.msra.mxu0 %v415_v8 }
  0x3b   :  { %397 = vmatpush3.bf16.msra.mxu1 %v423_v19 }
  0x3d   :  { %379 = vmatmul.mubr.bf16.vlgmr.msra.gmra.mxu0 %v51_v11 }
  0xfd   :  { %v157_v21 = vpop.f32.mrf.mxu0 }
  0xfe   :  { %v158_v22 = vadd.f32 %v317_v20, %v157_v21 }
  0xff   :  { %v380_v23 = vpop.f32.mrf.mxu0 }
 0x100   :  { %v164_v24 = vsub.f32 0.0, %v158_v22 }
 0x101   :  { %v160_v25 = vpop.f32.mrf.mxu0 }
 0x102   :  { %v166_v26 = vmul.f32 1.442695, %v164_v24  ;;  %v161_v27 = vadd.f32 %v317_v20, %v160_v25 }
 0x103   :  { %v381_v28 = vpop.f32.mrf.mxu0 }
 0x104   :  { %424 = vpow2.f32 %v166_v26  ;;  %v165_v29 = vsub.f32 0.0, %v161_v27 }
 0x106   :  { %v168_v30 = vmul.f32 1.442695, %v165_v29 }
 0x108   :  { %426 = vpow2.f32 %v168_v30 }
 0x111   :  { %v425_v31 = vpop.eup %424 }
 0x112   :  { %v170_v32 = vadd.f32 1.0, %v425_v31 }
 0x114   :  { %428 = vrcp.f32 %v170_v32 }
 0x115   :  { %v427_v33 = vpop.eup %426 }
 0x116   :  { %v171_v34 = vadd.f32 1.0, %v427_v33 }
 0x118   :  { %430 = vrcp.f32 %v171_v34 }
 0x121   :  { %v429_v35 = vpop.eup %428 }
 0x125   :  { %v431_v36 = vpop.eup %430 }
 0x126   :  { %v176_v37 = vpack.c.bf16 %v431_v36, %v429_v35 }
 0x128   :  { %399 = vmatmul.mubr.bf16.vlgmr.msra.gmra.mxu1 %v176_v37 }
 0x1e8   :  { %v282_v39 = vpop.f32.mrf.mxu1 }
 0x1e9   :  { %v283_v40 = vadd.f32 %v326_v38, %v282_v39 }
 0x1ea   :  { %v400_v41 = vpop.f32.mrf.mxu1 }
 0x1eb   :  { %v289_v42 = vsub.f32 0.0, %v283_v40 }
 0x1ec   :  { %v285_v43 = vpop.f32.mrf.mxu1 }
 0x1ed   :  { %v291_v44 = vmul.f32 1.442695, %v289_v42  ;;  %v286_v45 = vadd.f32 %v326_v38, %v285_v43 }
 0x1ee   :  { %v401_v46 = vpop.f32.mrf.mxu1 }
 0x1ef   :  { %432 = vpow2.f32 %v291_v44  ;;  %v290_v47 = vsub.f32 0.0, %v286_v45 }
 0x1f1   :  { %v293_v48 = vmul.f32 1.442695, %v290_v47 }
 0x1f3   :  { %434 = vpow2.f32 %v293_v48 }
 0x1fc   :  { %v433_v49 = vpop.eup %432 }
 0x1fd   :  { %v295_v50 = vadd.f32 1.0, %v433_v49 }
 0x1ff   :  { %436 = vrcp.f32 %v295_v50 }
 0x200   :  { %v435_v51 = vpop.eup %434 }
 0x201   :  { %v296_v52 = vadd.f32 1.0, %v435_v51 }
 0x203   :  { %438 = vrcp.f32 %v296_v52 }
 0x20c   :  { %v437_v53 = vpop.eup %436 }
 0x210   :  { %v439_v54 = vpop.eup %438 }
 0x211   :  { %v342_v55 = vpack.c.bf16 %v439_v54, %v437_v53 }
 0x213   :  { %343 = vst [vmem:[%s546_s5] sm:$0xff] %v342_v55  }
 0x214   :  { %315 = vsyncpa [#allocation3], 1 }
 0x215   :  { %316 = vsyncpa [#allocation5], 1 }

</bundles_post_ra>
